<compile_context>
chip_gen: v7x
topology: tpu7x:2x2x1
jax: 0.10.0
libtpu: 0.0.40
codegen_flags: <defaults>
</compile_context>

<pallas_src>
import functools

import jax
import jax.numpy as jnp
from jax import lax
from jax.experimental import pallas as pl
from jax.experimental.pallas import tpu as pltpu

NEG = -1e30  # finite "minus infinity" so the online-softmax math never NaNs


def _pick_tile(n, target):
    """Largest tile <= target that divides n and is a multiple of 8."""
    t = min(target, n)
    t -= t % 8
    while t > 8 and n % t != 0:
        t -= 8
    return max(t, 8)


def _validate_boundaries(boundaries, n):
    assert len(boundaries) >= 2, "group_index_tracking needs >= 2 entries"
    for lo, hi in zip(boundaries[:-1], boundaries[1:]):
        assert 0 <= lo < hi <= n, (
            f"segment [{lo}, {hi}) must be sorted, non-empty and within [0, {n}]")


def _build_block_schedule(n, tq, tk, boundaries):
    """Compact block-sparse schedule over (qi, ki) tiles.

    Returns int32 arrays (qi, ki, flags); flag bits:
      1: first ki-step for this qi block  (init accumulator)
      2: last  ki-step for this qi block  (finalize / write output)
      4: tile has at least one unmasked (q, k) pair  (do compute)
      8: tile needs the segment/causal mask          (not fully unmasked)
    """
    nq, nk = n // tq, n // tk
    segs = list(zip(boundaries[:-1], boundaries[1:]))
    qi_l, ki_l, fl_l = [], [], []
    for qi in range(nq):
        q0, q1 = qi * tq, (qi + 1) * tq
        entries = []
        for ki in range(nk):
            k0, k1 = ki * tk, (ki + 1) * tk
            any_valid = False
            fully_valid = False
            for lo, hi in segs:
                ql, qh = max(q0, lo), min(q1, hi)
                kl, kh = max(k0, lo), min(k1, hi)
                if ql < qh and kl < kh and kl < qh:           # causally feasible
                    any_valid = True
                if (lo <= q0 and q1 <= hi and lo <= k0 and k1 <= hi
                        and (k1 - 1) <= q0):                  # every pair valid
                    fully_valid = True
            if not any_valid:
                continue
            entries.append((ki, True, not fully_valid))
        if not entries:
            # q block has no segment rows: one dummy step that only zero-writes.
            entries = [(0, False, False)]
        for idx, (ki, do_comp, need_mask) in enumerate(entries):
            flags = 0
            flags |= 1 if idx == 0 else 0
            flags |= 2 if idx == len(entries) - 1 else 0
            flags |= 4 if do_comp else 0
            flags |= 8 if need_mask else 0
            qi_l.append(qi)
            ki_l.append(ki)
            fl_l.append(flags)
    return (jnp.asarray(qi_l, jnp.int32),
            jnp.asarray(ki_l, jnp.int32),
            jnp.asarray(fl_l, jnp.int32))


def _row_begin(q0, tq, boundaries, n_rows):
    """(TQ,1) segment-begin per query row (sentinel n_rows+1 outside segments)."""
    row_pos = q0 + lax.broadcasted_iota(jnp.int32, (tq, 1), 0)
    rb = jnp.full((tq, 1), n_rows + 1, dtype=jnp.int32)
    for lo, hi in zip(boundaries[:-1], boundaries[1:]):
        rb = jnp.where((row_pos >= lo) & (row_pos < hi), jnp.int32(lo), rb)
    return rb, row_pos


def _flash_kernel(qi_ref, ki_ref, flag_ref, q_ref, k_ref, v_ref, o_ref,
                  acc_sc, m_sc, l_sc, *, boundaries, scale, tq, tk, n_rows,
                  kv_resident, p_dtype, approx_recip):
    step = pl.program_id(0)
    qi = qi_ref[step]
    ki = ki_ref[step]
    flags = flag_ref[step]
    is_first = (flags & 1) != 0
    is_last = (flags & 2) != 0
    do_compute = (flags & 4) != 0
    need_mask = (flags & 8) != 0
    q0 = qi * tq
    k0 = ki * tk

    @pl.when(is_first)
    def _init():
        m_sc[...] = jnp.full_like(m_sc, NEG)
        l_sc[...] = jnp.zeros_like(l_sc)
        acc_sc[...] = jnp.zeros_like(acc_sc)

    @pl.when(do_compute)
    def _compute():
        q = q_ref[...]                                   # (tq, D) mxu dtype
        if kv_resident:
            start = pl.multiple_of(k0, tk)
            kb = k_ref[pl.ds(start, tk), :]              # slice resident K/V
            vb = v_ref[pl.ds(start, tk), :]
        else:
            kb = k_ref[...]
            vb = v_ref[...]

        # QK^T directly on the MXU (contract feature dim, no materialized k.T)
        s = lax.dot_general(q, kb, (((1,), (1,)), ((), ())),
                            preferred_element_type=jnp.float32) * scale

        def _update(s_tile, valid):
            m_prev = m_sc[...]
            m_new = jnp.maximum(m_prev, s_tile.max(axis=-1, keepdims=True))
            alpha = jnp.exp(m_prev - m_new)
            p = jnp.exp((s_tile - m_new).astype(p_dtype))
            if valid is not None:
                # load-bearing: rows with no valid key still have m == NEG and
                # exp(s - m_new) would otherwise evaluate to 1.
                p = jnp.where(valid, p, jnp.zeros_like(p))
            l_sc[...] = alpha * l_sc[...] + p.astype(jnp.float32).sum(
                axis=-1, keepdims=True)
            acc_sc[...] = alpha * acc_sc[...] + jnp.dot(
                p.astype(vb.dtype), vb, preferred_element_type=jnp.float32)
            m_sc[...] = m_new

        @pl.when(need_mask)
        def _masked():
            row = lax.broadcasted_iota(jnp.int32, (tq, tk), 0)
            col = lax.broadcasted_iota(jnp.int32, (tq, tk), 1)
            pos_q = q0 + row
            pos_k = k0 + col
            rb, _ = _row_begin(q0, tq, boundaries, n_rows)
            valid = (pos_k <= pos_q) & (pos_k >= rb)
            _update(jnp.where(valid, s, NEG), valid)

        @pl.when(jnp.logical_not(need_mask))
        def _unmasked():
            _update(s, None)

    @pl.when(is_last)
    def _finalize():
        l = l_sc[...]
        l_safe = jnp.where(l == 0.0, 1.0, l)
        out = acc_sc[...] * pl.reciprocal(l_safe, approx=approx_recip)
        rb, row_pos = _row_begin(q0, tq, boundaries, n_rows)
        in_segment = rb <= row_pos
        o_ref[...] = jnp.where(in_segment, out, 0.0).astype(o_ref.dtype)


def _device_vmem_budgets():
    """(resident K/V byte budget, vmem_limit_bytes) per TPU generation."""
    try:
        kind = jax.devices()[0].device_kind.lower()
    except Exception:  # pragma: no cover
        kind = ""
    if "v5" in kind or "v6" in kind:       # 128 MiB physical VMEM
        return 24 * 2**20, 96 * 2**20
    return 12 * 2**20, 44 * 2**20          # v7x (64 MiB physical) / unknown


def flash_attention_forward(q, k, v, *, group_index_tracking,
                            query_block_size=None, key_block_size=None,
                            mxu_dtype=jnp.bfloat16, p_dtype=None,
                            out_dtype=None):
    B, S, D = q.shape
    N = B * S
    assert N % 8 == 0, "flattened rows must be a multiple of 8 (TPU sublanes)"
    boundaries = tuple(int(b) for b in group_index_tracking)
    _validate_boundaries(boundaries, N)

    TQ = query_block_size or _pick_tile(N, 256)
    TK = key_block_size or _pick_tile(N, 256)
    assert N % TQ == 0 and N % TK == 0 and TQ % 8 == 0 and TK % 8 == 0

    mxu_is_bf16 = jnp.dtype(mxu_dtype) == jnp.dtype(jnp.bfloat16)
    if p_dtype is None:
        # bf16 exp only when the MXU operands are already bf16 (v6e/v7x bf16
        # EUP).  On v5e pass p_dtype=jnp.float32 explicitly.
        p_dtype = jnp.bfloat16 if mxu_is_bf16 else jnp.float32
    out_dtype = out_dtype or q.dtype
    approx_recip = jnp.dtype(p_dtype) == jnp.dtype(jnp.bfloat16)

    qf = q.reshape(N, D).astype(mxu_dtype)
    kf = k.reshape(N, D).astype(mxu_dtype)
    vf = v.reshape(N, D).astype(mxu_dtype)

    # Compact block-sparse schedule (scalar-prefetched into SMEM).
    qi_arr, ki_arr, fl_arr = _build_block_schedule(N, TQ, TK, boundaries)
    num_steps = int(qi_arr.shape[0])

    kv_budget, vmem_limit = _device_vmem_budgets()
    itemsize = jnp.dtype(mxu_dtype).itemsize
    kv_resident = (2 * N * D * itemsize) <= kv_budget
    if kv_resident:
        # K/V fully resident in VMEM (constant index_map): fetched once.
        k_spec = pl.BlockSpec((N, D), lambda s, qi, ki, fl: (0, 0))
        v_spec = pl.BlockSpec((N, D), lambda s, qi, ki, fl: (0, 0))
    else:
        k_spec = pl.BlockSpec((TK, D), lambda s, qi, ki, fl: (ki[s], 0))
        v_spec = pl.BlockSpec((TK, D), lambda s, qi, ki, fl: (ki[s], 0))

    scale = 1.0 / (D ** 0.5)
    kernel = functools.partial(
        _flash_kernel, boundaries=boundaries, scale=scale, tq=TQ, tk=TK,
        n_rows=N, kv_resident=kv_resident, p_dtype=p_dtype,
        approx_recip=approx_recip)

    out_flat = pl.pallas_call(
        kernel,
        out_shape=jax.ShapeDtypeStruct((N, D), out_dtype),
        grid_spec=pltpu.PrefetchScalarGridSpec(
            num_scalar_prefetch=3,
            grid=(num_steps,),
            in_specs=[
                pl.BlockSpec((TQ, D), lambda s, qi, ki, fl: (qi[s], 0)),   # q
                k_spec,                                                    # k
                v_spec,                                                    # v
            ],
            out_specs=pl.BlockSpec((TQ, D), lambda s, qi, ki, fl: (qi[s], 0)),
            scratch_shapes=[
                pltpu.VMEM((TQ, D), jnp.float32),   # f32 output accumulator
                pltpu.VMEM((TQ, 1), jnp.float32),   # running max
                pltpu.VMEM((TQ, 1), jnp.float32),   # running sum
            ],
        ),
        compiler_params=pltpu.CompilerParams(
            # Single sequential axis: steps sharing a qi block must run in
            # order (the output accumulator is resident across them).
            dimension_semantics=("arbitrary",),
            vmem_limit_bytes=vmem_limit,
        ),
    )(qi_arr, ki_arr, fl_arr, qf, kf, vf)

    return out_flat.reshape(B, S, D)


def _reference_forward(q, k, v, group_index_tracking):
    """Pure-JAX (f32) reproduction of the PyTorch module output."""
    B, S, D = q.shape
    N = B * S
    qf = q.reshape(N, D).astype(jnp.float32)
    kf = k.reshape(N, D).astype(jnp.float32)
    vf = v.reshape(N, D).astype(jnp.float32)
    out = jnp.zeros((N, D), jnp.float32)
    for g in range(len(group_index_tracking) - 1):
        s0, s1 = group_index_tracking[g], group_index_tracking[g + 1]
        L = s1 - s0
        sc = (qf[s0:s1] @ kf[s0:s1].T) / (D ** 0.5)
        causal = jnp.triu(jnp.ones((L, L), dtype=bool), 1)
        sc = jnp.where(causal, -jnp.inf, sc)
        w = jax.nn.softmax(sc, axis=-1)
        out = out.at[s0:s1].set(w @ vf[s0:s1])
    return out.reshape(B, S, D)


if __name__ == "__main__":
    # Small shapes consistent with the module: dim=32, batch*seq = 16 so the
    # default group_index_tracking=[4, 8, 12, 16] covers rows 4..16.
    batch, seq, dim = 2, 8, 32
    group_index_tracking = [4, 8, 12, 16]

    key = jax.random.PRNGKey(0)
    kq, kk, kv = jax.random.split(key, 3)
    q = jax.random.normal(kq, (batch, seq, dim), dtype=jnp.float32)
    k = jax.random.normal(kk, (batch, seq, dim), dtype=jnp.float32)
    v = jax.random.normal(kv, (batch, seq, dim), dtype=jnp.float32)

    ref = _reference_forward(q, k, v, group_index_tracking)

    # Full-precision path: f32 MXU operands, f32 exp, exact reciprocal.
    out_f32 = flash_attention_forward(
        q, k, v, group_index_tracking=group_index_tracking,
        mxu_dtype=jnp.float32)
    out_f32 = jax.block_until_ready(out_f32)
    assert out_f32.shape == (batch, seq, dim)
    assert out_f32.dtype == q.dtype
    assert jnp.allclose(out_f32, ref, atol=1e-2, rtol=1e-2), (
        f"f32 max diff {jnp.max(jnp.abs(out_f32 - ref))}")

    # Default bf16 MXU operands + bf16 exp (recommended on v6e/v7x); f32
    # accumulate and f32 softmax state, so only a small shift vs the f32 ref.
    out_bf16 = flash_attention_forward(
        q, k, v, group_index_tracking=group_index_tracking)
    out_bf16 = jax.block_until_ready(out_bf16)
    assert out_bf16.shape == (batch, seq, dim)
    assert jnp.allclose(out_bf16, ref, atol=8e-2, rtol=8e-2), (
        f"bf16 max diff {jnp.max(jnp.abs(out_bf16 - ref))}")

    print("KERNEL_OK")
</pallas_src>

<mosaic_0001>
module attributes {stable_mosaic.version = 11 : i64} {
  func.func @_flash_kernel(%arg0: i32, %arg1: memref<1xi32, #tpu.memory_space<smem>>, %arg2: memref<1xi32, #tpu.memory_space<smem>>, %arg3: memref<1xi32, #tpu.memory_space<smem>>, %arg4: memref<16x32xf32, #tpu.memory_space<vmem>>, %arg5: memref<16x32xf32, #tpu.memory_space<vmem>>, %arg6: memref<16x32xf32, #tpu.memory_space<vmem>>, %arg7: memref<16x32xf32, #tpu.memory_space<vmem>>, %arg8: memref<16x32xf32, #tpu.memory_space<vmem>>, %arg9: memref<16x1xf32, #tpu.memory_space<vmem>>, %arg10: memref<16x1xf32, #tpu.memory_space<vmem>>) attributes {dimension_semantics = [#tpu.dimension_semantics<arbitrary>], iteration_bounds = array<i64: 1>, scalar_prefetch = 3 : i64, scratch_operands = 3 : i64, tpu.core_type = #tpu.core_type<tc>, window_params = [{transform_indices = @transform_0, window_bounds = array<i64: 16, 32>}, {pipeline_mode = #tpu.pipeline_mode<synchronous>, transform_indices = @transform_1, window_bounds = array<i64: 16, 32>}, {pipeline_mode = #tpu.pipeline_mode<synchronous>, transform_indices = @transform_2, window_bounds = array<i64: 16, 32>}, {transform_indices = @transform_3, window_bounds = array<i64: 16, 32>}]} {
    %0 = arith.index_cast %arg0 : i32 to index
    %1 = memref.load %arg1[%0] : memref<1xi32, #tpu.memory_space<smem>>
    %2 = arith.index_cast %arg0 : i32 to index
    %3 = memref.load %arg2[%2] : memref<1xi32, #tpu.memory_space<smem>>
    %4 = arith.index_cast %arg0 : i32 to index
    %5 = memref.load %arg3[%4] : memref<1xi32, #tpu.memory_space<smem>>
    %c1_i32 = arith.constant 1 : i32
    %6 = arith.andi %5, %c1_i32 : i32
    %c0_i32 = arith.constant 0 : i32
    %7 = arith.cmpi ne, %6, %c0_i32 : i32
    %c2_i32 = arith.constant 2 : i32
    %8 = arith.andi %5, %c2_i32 : i32
    %c0_i32_0 = arith.constant 0 : i32
    %9 = arith.cmpi ne, %8, %c0_i32_0 : i32
    %c4_i32 = arith.constant 4 : i32
    %10 = arith.andi %5, %c4_i32 : i32
    %c0_i32_1 = arith.constant 0 : i32
    %11 = arith.cmpi ne, %10, %c0_i32_1 : i32
    %c8_i32 = arith.constant 8 : i32
    %12 = arith.andi %5, %c8_i32 : i32
    %c0_i32_2 = arith.constant 0 : i32
    %13 = arith.cmpi ne, %12, %c0_i32_2 : i32
    %c16_i32 = arith.constant 16 : i32
    %14 = arith.muli %1, %c16_i32 : i32
    %c16_i32_3 = arith.constant 16 : i32
    %15 = arith.muli %3, %c16_i32_3 : i32
    %16 = arith.extui %7 : i1 to i32
    %c0_i32_4 = arith.constant 0 : i32
    %17 = arith.cmpi ne, %16, %c0_i32_4 : i32
    scf.if %17 {
      %cst = arith.constant -1.000000e+30 : f32
      %22 = vector.broadcast %cst : f32 to vector<16x1xf32>
      %c0 = arith.constant 0 : index
      %c0_7 = arith.constant 0 : index
      %23 = vector.load %arg9[%c0, %c0_7] : memref<16x1xf32, #tpu.memory_space<vmem>>, vector<16x1xf32>
      tpu.vector_store %arg9[%c0, %c0_7], %22 {strides = array<i32>} : memref<16x1xf32, #tpu.memory_space<vmem>>, vector<16x1xf32>,
      %cst_8 = arith.constant 0.000000e+00 : f32
      %24 = vector.broadcast %cst_8 : f32 to vector<16x1xf32>
      %c0_9 = arith.constant 0 : index
      %c0_10 = arith.constant 0 : index
      %25 = vector.load %arg10[%c0_9, %c0_10] : memref<16x1xf32, #tpu.memory_space<vmem>>, vector<16x1xf32>
      tpu.vector_store %arg10[%c0_9, %c0_10], %24 {strides = array<i32>} : memref<16x1xf32, #tpu.memory_space<vmem>>, vector<16x1xf32>,
      %cst_11 = arith.constant 0.000000e+00 : f32
      %26 = vector.broadcast %cst_11 : f32 to vector<16x32xf32>
      %c0_12 = arith.constant 0 : index
      %c0_13 = arith.constant 0 : index
      %27 = vector.load %arg8[%c0_12, %c0_13] : memref<16x32xf32, #tpu.memory_space<vmem>>, vector<16x32xf32>
      tpu.vector_store %arg8[%c0_12, %c0_13], %26 {strides = array<i32>} : memref<16x32xf32, #tpu.memory_space<vmem>>, vector<16x32xf32>,
    } else {
    }
    %18 = arith.extui %11 : i1 to i32
    %c0_i32_5 = arith.constant 0 : i32
    %19 = arith.cmpi ne, %18, %c0_i32_5 : i32
    scf.if %19 {
      %c0 = arith.constant 0 : index
      %c0_7 = arith.constant 0 : index
      %22 = vector.load %arg4[%c0, %c0_7] : memref<16x32xf32, #tpu.memory_space<vmem>>, vector<16x32xf32>
      %23 = tpu.assume_multiple %15, 16 : i32
      %24 = arith.index_cast %23 : i32 to index
      %c0_8 = arith.constant 0 : index
      %25 = vector.load %arg5[%24, %c0_8] : memref<16x32xf32, #tpu.memory_space<vmem>>, vector<16x32xf32>
      %26 = arith.index_cast %23 : i32 to index
      %c0_9 = arith.constant 0 : index
      %27 = vector.load %arg6[%26, %c0_9] : memref<16x32xf32, #tpu.memory_space<vmem>>, vector<16x32xf32>
      %cst = arith.constant dense<0.000000e+00> : vector<16x16xf32>
      %28 = tpu.matmul %22, %25, %cst {dimension_numbers = #tpu.dot_dimension_numbers<[1], [1], [0], [0], [0, 0, 1, 0], [], []>} : vector<16x32xf32>, vector<16x32xf32>, vector<16x16xf32> -> vector<16x16xf32>
      %cst_10 = arith.constant 0.176776692 : f32
      %29 = vector.broadcast %cst_10 : f32 to vector<16x16xf32>
      %30 = arith.mulf %28, %29 : vector<16x16xf32>
      %31 = arith.extui %13 : i1 to i32
      %c0_i32_11 = arith.constant 0 : i32
      %32 = arith.cmpi ne, %31, %c0_i32_11 : i32
      scf.if %32 {
        %36 = tpu.iota {dimensions = array<i32: 0>} : vector<16x16xi32>
        %37 = tpu.iota {dimensions = array<i32: 1>} : vector<16x16xi32>
        %38 = vector.broadcast %14 : i32 to vector<16x16xi32>
        %39 = arith.addi %38, %36 : vector<16x16xi32>
        %40 = vector.broadcast %15 : i32 to vector<16x16xi32>
        %41 = arith.addi %40, %37 : vector<16x16xi32>
        %42 = tpu.iota {dimensions = array<i32: 0>} : vector<16x1xi32>
        %43 = vector.broadcast %14 : i32 to vector<16x1xi32>
        %44 = arith.addi %43, %42 : vector<16x1xi32>
        %c17_i32 = arith.constant 17 : i32
        %45 = vector.broadcast %c17_i32 : i32 to vector<16x1xi32>
        %c4_i32_13 = arith.constant 4 : i32
        %46 = vector.broadcast %c4_i32_13 : i32 to vector<16x1xi32>
        %47 = arith.cmpi sge, %44, %46 : vector<16x1xi32>
        %c8_i32_14 = arith.constant 8 : i32
        %48 = vector.broadcast %c8_i32_14 : i32 to vector<16x1xi32>
        %49 = arith.cmpi slt, %44, %48 : vector<16x1xi32>
        %50 = arith.andi %47, %49 : vector<16x1xi1>
        %c4_i32_15 = arith.constant 4 : i32
        %51 = vector.broadcast %c4_i32_15 : i32 to vector<16x1xi32>
        %52 = arith.select %50, %51, %45 : vector<16x1xi1>, vector<16x1xi32>
        %c8_i32_16 = arith.constant 8 : i32
        %53 = vector.broadcast %c8_i32_16 : i32 to vector<16x1xi32>
        %54 = arith.cmpi sge, %44, %53 : vector<16x1xi32>
        %c12_i32 = arith.constant 12 : i32
        %55 = vector.broadcast %c12_i32 : i32 to vector<16x1xi32>
        %56 = arith.cmpi slt, %44, %55 : vector<16x1xi32>
        %57 = arith.andi %54, %56 : vector<16x1xi1>
        %c8_i32_17 = arith.constant 8 : i32
        %58 = vector.broadcast %c8_i32_17 : i32 to vector<16x1xi32>
        %59 = arith.select %57, %58, %52 : vector<16x1xi1>, vector<16x1xi32>
        %c12_i32_18 = arith.constant 12 : i32
        %60 = vector.broadcast %c12_i32_18 : i32 to vector<16x1xi32>
        %61 = arith.cmpi sge, %44, %60 : vector<16x1xi32>
        %c16_i32_19 = arith.constant 16 : i32
        %62 = vector.broadcast %c16_i32_19 : i32 to vector<16x1xi32>
        %63 = arith.cmpi slt, %44, %62 : vector<16x1xi32>
        %64 = arith.andi %61, %63 : vector<16x1xi1>
        %c12_i32_20 = arith.constant 12 : i32
        %65 = vector.broadcast %c12_i32_20 : i32 to vector<16x1xi32>
        %66 = arith.select %64, %65, %59 : vector<16x1xi1>, vector<16x1xi32>
        %67 = arith.cmpi sle, %41, %39 : vector<16x16xi32>
        %68 = vector.broadcast %66 : vector<16x1xi32> to vector<16x16xi32>
        %69 = arith.cmpi sge, %41, %68 : vector<16x16xi32>
        %70 = arith.andi %67, %69 : vector<16x16xi1>
        %cst_21 = arith.constant -1.000000e+30 : f32
        %71 = vector.broadcast %cst_21 : f32 to vector<16x16xf32>
        %72 = arith.select %70, %30, %71 : vector<16x16xi1>, vector<16x16xf32>
        %c0_22 = arith.constant 0 : index
        %c0_23 = arith.constant 0 : index
        %73 = vector.load %arg9[%c0_22, %c0_23] : memref<16x1xf32, #tpu.memory_space<vmem>>, vector<16x1xf32>
        %cst_24 = arith.constant dense<0xFF800000> : vector<16xf32>
        %74 = vector.multi_reduction <maximumf>, %72, %cst_24 [1] : vector<16x16xf32> to vector<16xf32>
        %75 = vector.shape_cast %74 : vector<16xf32> to vector<16x1xf32>
        %76 = arith.maximumf %73, %75 : vector<16x1xf32>
        %77 = arith.subf %73, %76 : vector<16x1xf32>
        %78 = math.exp %77 : vector<16x1xf32>
        %79 = vector.broadcast %76 : vector<16x1xf32> to vector<16x16xf32>
        %80 = arith.subf %72, %79 : vector<16x16xf32>
        %81 = math.exp %80 : vector<16x16xf32>
        %cst_25 = arith.constant 0.000000e+00 : f32
        %82 = vector.broadcast %cst_25 : f32 to vector<16x16xf32>
        %83 = arith.select %70, %81, %82 : vector<16x16xi1>, vector<16x16xf32>
        %c0_26 = arith.constant 0 : index
        %c0_27 = arith.constant 0 : index
        %84 = vector.load %arg10[%c0_26, %c0_27] : memref<16x1xf32, #tpu.memory_space<vmem>>, vector<16x1xf32>
        %85 = arith.mulf %78, %84 : vector<16x1xf32>
        %cst_28 = arith.constant dense<0.000000e+00> : vector<16xf32>
        %86 = vector.multi_reduction <add>, %83, %cst_28 [1] : vector<16x16xf32> to vector<16xf32>
        %87 = vector.shape_cast %86 : vector<16xf32> to vector<16x1xf32>
        %88 = arith.addf %85, %87 : vector<16x1xf32>
        %c0_29 = arith.constant 0 : index
        %c0_30 = arith.constant 0 : index
        %89 = vector.load %arg10[%c0_29, %c0_30] : memref<16x1xf32, #tpu.memory_space<vmem>>, vector<16x1xf32>
        tpu.vector_store %arg10[%c0_29, %c0_30], %88 {strides = array<i32>} : memref<16x1xf32, #tpu.memory_space<vmem>>, vector<16x1xf32>,
        %c0_31 = arith.constant 0 : index
        %c0_32 = arith.constant 0 : index
        %90 = vector.load %arg8[%c0_31, %c0_32] : memref<16x32xf32, #tpu.memory_space<vmem>>, vector<16x32xf32>
        %91 = vector.broadcast %78 : vector<16x1xf32> to vector<16x32xf32>
        %92 = arith.mulf %91, %90 : vector<16x32xf32>
        %cst_33 = arith.constant dense<0.000000e+00> : vector<16x32xf32>
        %93 = tpu.matmul %83, %27, %cst_33 {dimension_numbers = #tpu.dot_dimension_numbers<[1], [0], [0], [1], [0, 0, 1, 1], [], []>} : vector<16x16xf32>, vector<16x32xf32>, vector<16x32xf32> -> vector<16x32xf32>
        %94 = arith.addf %92, %93 : vector<16x32xf32>
        %c0_34 = arith.constant 0 : index
        %c0_35 = arith.constant 0 : index
        %95 = vector.load %arg8[%c0_34, %c0_35] : memref<16x32xf32, #tpu.memory_space<vmem>>, vector<16x32xf32>
        tpu.vector_store %arg8[%c0_34, %c0_35], %94 {strides = array<i32>} : memref<16x32xf32, #tpu.memory_space<vmem>>, vector<16x32xf32>,
        %c0_36 = arith.constant 0 : index
        %c0_37 = arith.constant 0 : index
        %96 = vector.load %arg9[%c0_36, %c0_37] : memref<16x1xf32, #tpu.memory_space<vmem>>, vector<16x1xf32>
        tpu.vector_store %arg9[%c0_36, %c0_37], %76 {strides = array<i32>} : memref<16x1xf32, #tpu.memory_space<vmem>>, vector<16x1xf32>,
      } else {
      }
      %true = arith.constant true
      %33 = arith.xori %13, %true : i1
      %34 = arith.extui %33 : i1 to i32
      %c0_i32_12 = arith.constant 0 : i32
      %35 = arith.cmpi ne, %34, %c0_i32_12 : i32
      scf.if %35 {
        %c0_13 = arith.constant 0 : index
        %c0_14 = arith.constant 0 : index
        %36 = vector.load %arg9[%c0_13, %c0_14] : memref<16x1xf32, #tpu.memory_space<vmem>>, vector<16x1xf32>
        %cst_15 = arith.constant dense<0xFF800000> : vector<16xf32>
        %37 = vector.multi_reduction <maximumf>, %30, %cst_15 [1] : vector<16x16xf32> to vector<16xf32>
        %38 = vector.shape_cast %37 : vector<16xf32> to vector<16x1xf32>
        %39 = arith.maximumf %36, %38 : vector<16x1xf32>
        %40 = arith.subf %36, %39 : vector<16x1xf32>
        %41 = math.exp %40 : vector<16x1xf32>
        %42 = vector.broadcast %39 : vector<16x1xf32> to vector<16x16xf32>
        %43 = arith.subf %30, %42 : vector<16x16xf32>
        %44 = math.exp %43 : vector<16x16xf32>
        %c0_16 = arith.constant 0 : index
        %c0_17 = arith.constant 0 : index
        %45 = vector.load %arg10[%c0_16, %c0_17] : memref<16x1xf32, #tpu.memory_space<vmem>>, vector<16x1xf32>
        %46 = arith.mulf %41, %45 : vector<16x1xf32>
        %cst_18 = arith.constant dense<0.000000e+00> : vector<16xf32>
        %47 = vector.multi_reduction <add>, %44, %cst_18 [1] : vector<16x16xf32> to vector<16xf32>
        %48 = vector.shape_cast %47 : vector<16xf32> to vector<16x1xf32>
        %49 = arith.addf %46, %48 : vector<16x1xf32>
        %c0_19 = arith.constant 0 : index
        %c0_20 = arith.constant 0 : index
        %50 = vector.load %arg10[%c0_19, %c0_20] : memref<16x1xf32, #tpu.memory_space<vmem>>, vector<16x1xf32>
        tpu.vector_store %arg10[%c0_19, %c0_20], %49 {strides = array<i32>} : memref<16x1xf32, #tpu.memory_space<vmem>>, vector<16x1xf32>,
        %c0_21 = arith.constant 0 : index
        %c0_22 = arith.constant 0 : index
        %51 = vector.load %arg8[%c0_21, %c0_22] : memref<16x32xf32, #tpu.memory_space<vmem>>, vector<16x32xf32>
        %52 = vector.broadcast %41 : vector<16x1xf32> to vector<16x32xf32>
        %53 = arith.mulf %52, %51 : vector<16x32xf32>
        %cst_23 = arith.constant dense<0.000000e+00> : vector<16x32xf32>
        %54 = tpu.matmul %44, %27, %cst_23 {dimension_numbers = #tpu.dot_dimension_numbers<[1], [0], [0], [1], [0, 0, 1, 1], [], []>} : vector<16x16xf32>, vector<16x32xf32>, vector<16x32xf32> -> vector<16x32xf32>
        %55 = arith.addf %53, %54 : vector<16x32xf32>
        %c0_24 = arith.constant 0 : index
        %c0_25 = arith.constant 0 : index
        %56 = vector.load %arg8[%c0_24, %c0_25] : memref<16x32xf32, #tpu.memory_space<vmem>>, vector<16x32xf32>
        tpu.vector_store %arg8[%c0_24, %c0_25], %55 {strides = array<i32>} : memref<16x32xf32, #tpu.memory_space<vmem>>, vector<16x32xf32>,
        %c0_26 = arith.constant 0 : index
        %c0_27 = arith.constant 0 : index
        %57 = vector.load %arg9[%c0_26, %c0_27] : memref<16x1xf32, #tpu.memory_space<vmem>>, vector<16x1xf32>
        tpu.vector_store %arg9[%c0_26, %c0_27], %39 {strides = array<i32>} : memref<16x1xf32, #tpu.memory_space<vmem>>, vector<16x1xf32>,
      } else {
      }
    } else {
    }
    %20 = arith.extui %9 : i1 to i32
    %c0_i32_6 = arith.constant 0 : i32
    %21 = arith.cmpi ne, %20, %c0_i32_6 : i32
    scf.if %21 {
      %c0 = arith.constant 0 : index
      %c0_7 = arith.constant 0 : index
      %22 = vector.load %arg10[%c0, %c0_7] : memref<16x1xf32, #tpu.memory_space<vmem>>, vector<16x1xf32>
      %cst = arith.constant 0.000000e+00 : f32
      %23 = vector.broadcast %cst : f32 to vector<16x1xf32>
      %24 = arith.cmpf oeq, %22, %23 : vector<16x1xf32>
      %cst_8 = arith.constant 1.000000e+00 : f32
      %25 = vector.broadcast %cst_8 : f32 to vector<16x1xf32>
      %26 = arith.select %24, %25, %22 : vector<16x1xi1>, vector<16x1xf32>
      %c0_9 = arith.constant 0 : index
      %c0_10 = arith.constant 0 : index
      %27 = vector.load %arg8[%c0_9, %c0_10] : memref<16x32xf32, #tpu.memory_space<vmem>>, vector<16x32xf32>
      %28 = tpu.reciprocal %26 : vector<16x1xf32> -> vector<16x1xf32>
      %29 = vector.broadcast %28 : vector<16x1xf32> to vector<16x32xf32>
      %30 = arith.mulf %27, %29 : vector<16x32xf32>
      %31 = tpu.iota {dimensions = array<i32: 0>} : vector<16x1xi32>
      %32 = vector.broadcast %14 : i32 to vector<16x1xi32>
      %33 = arith.addi %32, %31 : vector<16x1xi32>
      %c17_i32 = arith.constant 17 : i32
      %34 = vector.broadcast %c17_i32 : i32 to vector<16x1xi32>
      %c4_i32_11 = arith.constant 4 : i32
      %35 = vector.broadcast %c4_i32_11 : i32 to vector<16x1xi32>
      %36 = arith.cmpi sge, %33, %35 : vector<16x1xi32>
      %c8_i32_12 = arith.constant 8 : i32
      %37 = vector.broadcast %c8_i32_12 : i32 to vector<16x1xi32>
      %38 = arith.cmpi slt, %33, %37 : vector<16x1xi32>
      %39 = arith.andi %36, %38 : vector<16x1xi1>
      %c4_i32_13 = arith.constant 4 : i32
      %40 = vector.broadcast %c4_i32_13 : i32 to vector<16x1xi32>
      %41 = arith.select %39, %40, %34 : vector<16x1xi1>, vector<16x1xi32>
      %c8_i32_14 = arith.constant 8 : i32
      %42 = vector.broadcast %c8_i32_14 : i32 to vector<16x1xi32>
      %43 = arith.cmpi sge, %33, %42 : vector<16x1xi32>
      %c12_i32 = arith.constant 12 : i32
      %44 = vector.broadcast %c12_i32 : i32 to vector<16x1xi32>
      %45 = arith.cmpi slt, %33, %44 : vector<16x1xi32>
      %46 = arith.andi %43, %45 : vector<16x1xi1>
      %c8_i32_15 = arith.constant 8 : i32
      %47 = vector.broadcast %c8_i32_15 : i32 to vector<16x1xi32>
      %48 = arith.select %46, %47, %41 : vector<16x1xi1>, vector<16x1xi32>
      %c12_i32_16 = arith.constant 12 : i32
      %49 = vector.broadcast %c12_i32_16 : i32 to vector<16x1xi32>
      %50 = arith.cmpi sge, %33, %49 : vector<16x1xi32>
      %c16_i32_17 = arith.constant 16 : i32
      %51 = vector.broadcast %c16_i32_17 : i32 to vector<16x1xi32>
      %52 = arith.cmpi slt, %33, %51 : vector<16x1xi32>
      %53 = arith.andi %50, %52 : vector<16x1xi1>
      %c12_i32_18 = arith.constant 12 : i32
      %54 = vector.broadcast %c12_i32_18 : i32 to vector<16x1xi32>
      %55 = arith.select %53, %54, %48 : vector<16x1xi1>, vector<16x1xi32>
      %56 = arith.cmpi sle, %55, %33 : vector<16x1xi32>
      %cst_19 = arith.constant 0.000000e+00 : f32
      %57 = vector.shape_cast %56 : vector<16x1xi1> to vector<16x1xi1>
      %58 = vector.broadcast %57 : vector<16x1xi1> to vector<16x32xi1>
      %59 = vector.broadcast %cst_19 : f32 to vector<16x32xf32>
      %60 = arith.select %58, %30, %59 : vector<16x32xi1>, vector<16x32xf32>
      %c0_20 = arith.constant 0 : index
      %c0_21 = arith.constant 0 : index
      %61 = vector.load %arg7[%c0_20, %c0_21] : memref<16x32xf32, #tpu.memory_space<vmem>>, vector<16x32xf32>
      tpu.vector_store %arg7[%c0_20, %c0_21], %60 {strides = array<i32>} : memref<16x32xf32, #tpu.memory_space<vmem>>, vector<16x32xf32>,
    } else {
    }
    return
  }
  func.func @transform_0(%arg0: i32, %arg1: memref<1xi32, #tpu.memory_space<smem>>, %arg2: memref<1xi32, #tpu.memory_space<smem>>, %arg3: memref<1xi32, #tpu.memory_space<smem>>) -> (i32, i32) {
    %0 = arith.index_cast %arg0 : i32 to index
    %1 = memref.load %arg1[%0] : memref<1xi32, #tpu.memory_space<smem>>
    %c0_i32 = arith.constant 0 : i32
    %c0_i32_0 = arith.constant 0 : i32
    return %1, %c0_i32 : i32, i32
  }
  func.func @transform_1(%arg0: i32, %arg1: memref<1xi32, #tpu.memory_space<smem>>, %arg2: memref<1xi32, #tpu.memory_space<smem>>, %arg3: memref<1xi32, #tpu.memory_space<smem>>) -> (i32, i32) {
    %c0_i32 = arith.constant 0 : i32
    %c0_i32_0 = arith.constant 0 : i32
    %c0_i32_1 = arith.constant 0 : i32
    return %c0_i32, %c0_i32_0 : i32, i32
  }
  func.func @transform_2(%arg0: i32, %arg1: memref<1xi32, #tpu.memory_space<smem>>, %arg2: memref<1xi32, #tpu.memory_space<smem>>, %arg3: memref<1xi32, #tpu.memory_space<smem>>) -> (i32, i32) {
    %c0_i32 = arith.constant 0 : i32
    %c0_i32_0 = arith.constant 0 : i32
    %c0_i32_1 = arith.constant 0 : i32
    return %c0_i32, %c0_i32_0 : i32, i32
  }
  func.func @transform_3(%arg0: i32, %arg1: memref<1xi32, #tpu.memory_space<smem>>, %arg2: memref<1xi32, #tpu.memory_space<smem>>, %arg3: memref<1xi32, #tpu.memory_space<smem>>) -> (i32, i32) {
    %0 = arith.index_cast %arg0 : i32 to index
    %1 = memref.load %arg1[%0] : memref<1xi32, #tpu.memory_space<smem>>
    %c0_i32 = arith.constant 0 : i32
    %c0_i32_0 = arith.constant 0 : i32
    return %1, %c0_i32 : i32, i32
  }
}

</mosaic_0001>

<bundles_post_ra>
// kernel: tpu_custom_call.1
= control target key start
LH: loop header
LB: loop body
LE: loop exit
PB: predicated region body
PF: predicated region fallthrough
CT: control target
= control target key end

     0   :  { %s1009_s0 = inlined_call_operand.<no memory space> [shape: s32[1], index: 0, kind: input, shape index: {}]   ;;  %s1010_s1 = inlined_call_operand.<no memory space> [shape: s32[1], index: 1, kind: input, shape index: {}]   ;;  %s1011_s2 = inlined_call_operand.<no memory space> [shape: s32[1], index: 2, kind: input, shape index: {}]   ;;  %s1012_s3 = inlined_call_operand.hbm [shape: f32[16,32], index: 3, kind: input, shape index: {}]   ;;  %s1013_s4 = inlined_call_operand.hbm [shape: f32[16,32], index: 4, kind: input, shape index: {}]   ;;  %s1014_s5 = inlined_call_operand.vmem [shape: f32[16,32], index: 5, kind: input, shape index: {}]   ;;  %s1015_s6 = inlined_call_operand.hbm [shape: f32[16,32], index: 6, kind: output, shape index: {}]  }
   0x1   :  { %11 = sst [smem:[#allocation6]] %s1009_s0 }
   0x2   :  { %14 = vsyncpa [#allocation10], 0 }
   0x3   :  { %15 = vsyncpa [#allocation13], 0 }
   0x4   :  { %16 = vsyncpa [#allocation11], 0  ;;  %s19_s23 = sld [smem:[#allocation6]]  ;;  %s808_s24 = smov [#allocation9]  }
   0x5   :  { %s26_s25 = sshll.u32 %s808_s24, 4  ;;  %s809_s26 = smov [#allocation12]   ;;  %s27_s25 = int_to_ptr.vmem [resolvable:$true] %s26_s25 }
   0x6   :  { %s38_s27 = sshll.u32 %s809_s26, 4  ;;  %s734_s10 = scalar_lea.hbm %s1012_s3, 256  ;;  %s858_s27 = int_to_ptr.vmem [resolvable:$true] %s38_s27 }
   0xa   :  { %s646_s28 = sshll.u32 %s19_s23, 8 }
   0xb   :  { %s25_s7 = scalar_lea.hbm %s1012_s3, %s646_s28 }
   0xc   :  { %s732_s8 = scalar_lea.hbm %s25_s7, 256  ;;  %p735_p1 = scmp.lt.u32.totalorder %s25_s7, %s1012_s3 }
   0xd   :  { %p733_p0 = scmp.ne.s32.totalorder %s25_s7, %s732_s8  ;;  %p736_p2 = scmp.lt.u32.totalorder %s734_s10, %s732_s8 }
   0xe   :  { %p738_p4 = scmp.lt.u32.totalorder %s732_s8, %s25_s7 }
   0xf   :  { %p737_p3 = por %p736_p2, %p735_p1 }
  0x11   :  { %p739_p5 = por %p738_p4, %p737_p3 }
  0x13   :  { %p740_p6 = pnand %p739_p5, %p733_p0 }
  0x15   :  { %743 = shalt.err (!%p740_p6)
}
  0x16   :  { %s744_s13 = scalar_lea.vmem %s27_s25, 256  ;;  %p749_p8 = scmp.lt.s32.totalorder %s27_s25, %s27_s25 }
  0x17   :  { %p745_p7 = scmp.ne.s32.totalorder %s27_s25, %s744_s13  ;;  %p750_p9 = scmp.lt.s32.totalorder %s744_s13, %s744_s13 }
  0x19   :  { %p751_p10 = por %p750_p9, %p749_p8 }
  0x1b   :  { %p752_p11 = pnand %p751_p10, %p745_p7 }
  0x1d   :  { %755 = shalt.err (!%p752_p11)
}
  0x1e   :  { %s810_s14 = smov 128   ;;  %s811_s15 = smov 8  }
  0x1f   :  { %32 = dma.hbm_to_vmem [thread:$0]  %s25_s7, 256, %s27_s25, [#allocation10], %s810_s14, %s810_s14, %s811_s15  }
  0x20   :  { %s756_s17 = scalar_lea.hbm %s1013_s4, 256 }
  0x21   :  { %p757_p12 = scmp.ne.s32.totalorder %s1013_s4, %s756_s17  ;;  %p760_p13 = scmp.lt.u32.totalorder %s756_s17, %s1013_s4 }
  0x23   :  { %p762_p0 = pnand %p760_p13, %p757_p12 }
  0x25   :  { %765 = shalt.err (!%p762_p0)
}
  0x26   :  { %s766_s22 = scalar_lea.vmem %s858_s27, 256  ;;  %p771_p2 = scmp.lt.s32.totalorder %s858_s27, %s858_s27 }
  0x27   :  { %p767_p1 = scmp.ne.s32.totalorder %s858_s27, %s766_s22  ;;  %p772_p3 = scmp.lt.s32.totalorder %s766_s22, %s766_s22 }
  0x29   :  { %p773_p4 = por %p772_p3, %p771_p2 }
  0x2b   :  { %p774_p5 = pnand %p773_p4, %p767_p1 }
  0x2d   :  { %777 = shalt.err (!%p774_p5)
}
  0x2e   :  { %44 = dma.hbm_to_vmem [thread:$0]  %s1013_s4, 256, %s858_s27, [#allocation13], %s810_s14, %s810_s14, %s811_s15  }
  0x2f   :  { %802 = dma.done.wait [#allocation10], 256  }
  0x30   :  { %803 = vsyncadd [#allocation10], 4294967040 }
  0x31   :  { %804 = dma.done.wait [#allocation13], 256  }
  0x32   :  { %805 = vsyncadd [#allocation13], 4294967040  ;;  %s60_s28 = sand.u32 1, %s1011_s2  ;;  %s62_s7 = sand.u32 2, %s1011_s2 }
  0x33   :  { %s898_s8 = sld [smem:[#allocation6]]  ;;  %s64_s10 = sand.u32 4, %s1011_s2 }
  0x34   :  { %s66_s11 = sand.u32 8, %s1011_s2  ;;  %s909_s3 = sshll.u32 %s1010_s1, 4 }
  0x35   :  { %p631_p6 = scmp.eq.s32.totalorder %s60_s28, 0 }
  0x36   :  { %vm73_vm0 = vcmask (!%p631_p6), 7168   ;;  %vm78_vm1 = vcmask (!%p631_p6), 261120   ;;  %v812_v0 = vmov (!%p631_p6), -1e+30   ;;  %v813_v1 = vmov (!%p631_p6), 0.0  }
  0x37   :  { %72 = sbr.rel (%p631_p6) target bundleno = 62 (0x3e), region = 25  ;;  %74 = vst.msk [vmem:[#allocation3] sm:$0xff] (!%p631_p6), %vm73_vm0, %v812_v0  ;;  %75 = vst.msk [vmem:[#allocation3 + $0x8] sm:$0xff] (!%p631_p6), %vm73_vm0, %v812_v0 }
  0x38   :  { %76 = vst.msk [vmem:[#allocation4] sm:$0xff] (!%p631_p6), %vm73_vm0, %v813_v1  ;;  %77 = vst.msk [vmem:[#allocation4 + $0x8] sm:$0xff] (!%p631_p6), %vm73_vm0, %v813_v1 }
  0x39   :  { %s629_s16 = sshll.u32 %s898_s8, 4  ;;  %79 = vst.msk [vmem:[#allocation2] sm:$0xff] (!%p631_p6), %vm78_vm1, %v813_v1  ;;  %80 = vst.msk [vmem:[#allocation2 + $0x8] sm:$0xff] (!%p631_p6), %vm78_vm1, %v813_v1 }
  0x3e PF:  { %p632_p7 = scmp.eq.s32.totalorder %s64_s10, 0 }
  0x3f   :  { %s89_s18 = scalar_lea.vmem (!%p632_p7), %s1014_s5, %s909_s3  ;;  %vm1016_vm2 = vcmask (!%p632_p7), 261120   ;;  %v84_v2 = vld [vmem:[#allocation9] sm:$0xff] (!%p632_p7)  ;;  %s86_s19 = scalar_lea.vmem (!%p632_p7), [#allocation12], %s909_s3  ;;  %v85_v8 = vld [vmem:[#allocation9 + $0x8] sm:$0xff] (!%p632_p7) }
  0x40   :  { %83 = sbr.rel (%p632_p7) target bundleno = 1310 (0x51e), region = 29  ;;  %v87_v3 = vld [vmem:[%s86_s19] sm:$0xff] (!%p632_p7)  ;;  %v88_v4 = vld [vmem:[%s86_s19 + $0x8] sm:$0xff] (!%p632_p7)  ;;  %664 = vmatprep.mubr.msk.f32.mxu0 (!%p632_p7), %vm1016_vm2, %v84_v2  ;;  %vm682_vm3 = vmpackc.low (!%p632_p7), %vm1016_vm2, %vm1016_vm2  ;;  %p637_p8 = scmp.eq.s32.totalorder (!%p632_p7), %s66_s11, 0 }
  0x41   :  { %v917_v5 = vld [vmem:[%s89_s18] sm:$0xff] (!%p632_p7)  ;;  %v920_v6 = vld [vmem:[%s89_s18 + $0x8] sm:$0xff] (!%p632_p7)  ;;  %v681_v7 = vpack.c.bf16 (!%p632_p7), %v88_v4, %v87_v3 }
  0x43   :  { %683 = vmatprep.subr.msk.bf16.mxu0 (!%p632_p7), %vm682_vm3, %v681_v7 }
  0x44   :  { %686 = vmatpush3.bf16.xpose.msk.msra.mxu0 (!%p632_p7), %vm682_vm3, %v681_v7 }
  0x47   :  { %v185_v13 = vlaneseq (!%p637_p8)  ;;  %v190_v14 = vstv (!%p637_p8), %s629_s16  ;;  %v193_v15 = vstv (!%p637_p8), %s909_s3  ;;  %v814_v22 = vmov (!%p637_p8), 17   ;;  %v227_v36 = vld [vmem:[#allocation3] sm:$0xff] (!%p637_p8)  ;;  %v228_v39 = vld [vmem:[#allocation3 + $0x8] sm:$0xff] (!%p637_p8)  ;;  %v262_v61 = vld [vmem:[#allocation4] sm:$0xff] (!%p637_p8) }
  0x48   :  { %v815_v35 = vmov (!%p637_p8), 0   ;;  %v687_v44 = vpack.c.bf16 (!%p637_p8), %v920_v6, %v917_v5  ;;  %v263_v0 = vld [vmem:[#allocation4 + $0x8] sm:$0xff] (!%p637_p8) }
  0x49   :  { %v186_v16 = vshrl.u32 (!%p637_p8), %v185_v13, 7  ;;  %v189_v17 = vand.u32 (!%p637_p8), 127, %v185_v13  ;;  %707 = vset.pattern.permute.xlu1 (!%p637_p8), %v815_v35  ;;  %708 = vset.pattern.permute.xlu0 (!%p637_p8), %v815_v35  ;;  %v278_v7 = vld [vmem:[#allocation2 + $0x8] sm:$0xff] (!%p637_p8) }
  0x4a   :  { %688 = vmatprep.subr.bf16.mxu0 (!%p637_p8), %v687_v44 }
  0x4b   :  { %665 = vmatmul.mubr.msk.f32.vlgmr.msra.gmra.mrb[0].mxu0 %vm1016_vm2, %v85_v8  ;;  %v191_v18 = vadd.s32 (!%p637_p8), %v190_v14, %v186_v16  ;;  %v194_v19 = vadd.s32 (!%p637_p8), %v193_v15, %v189_v17  ;;  %v187_v20 = vadd.s32 (!%p637_p8), 8, %v186_v16 }
  0x4c   :  { %690 = vmatpush3.bf16.msra.mxu0 (!%p637_p8), %v687_v44 }
  0x4d   :  { %vm195_vm4 = vcmp.ge.s32.totalorder (!%p637_p8), %v191_v18, 4  ;;  %vm197_vm5 = vcmp.lt.s32.totalorder (!%p637_p8), %v191_v18, 8  ;;  %vm203_vm6 = vcmp.ge.s32.totalorder (!%p637_p8), %v191_v18, 8  ;;  %vm205_vm7 = vcmp.lt.s32.totalorder (!%p637_p8), %v191_v18, 12 }
  0x4e   :  { %vm199_vm8 = vmand (!%p637_p8), %vm195_vm4, %vm197_vm5  ;;  %vm211_vm9 = vcmp.ge.s32.totalorder (!%p637_p8), %v191_v18, 12  ;;  %vm213_vm10 = vcmp.lt.s32.totalorder (!%p637_p8), %v191_v18, 16  ;;  %v192_v21 = vadd.s32 (!%p637_p8), %v190_v14, %v187_v20  ;;  %vm219_vm12 = vcmp.le.s32.totalorder (!%p637_p8), %v194_v19, %v191_v18 }
  0x4f   :  { %v201_v23 = vsel (!%p637_p8), %vm199_vm8, 4, %v814_v22  ;;  %vm207_vm11 = vmand (!%p637_p8), %vm203_vm6, %vm205_vm7  ;;  %vm229_vm8 = vcmask (!%p637_p8), 130048  }
  0x50   :  { %v209_v24 = vsel (!%p637_p8), %vm207_vm11, 8, %v201_v23  ;;  %vm215_vm13 = vmand (!%p637_p8), %vm211_vm9, %vm213_vm10  ;;  %vm196_vm14 = vcmp.ge.s32.totalorder (!%p637_p8), %v192_v21, 4  ;;  %vm198_vm15 = vcmp.lt.s32.totalorder (!%p637_p8), %v192_v21, 8  ;;  %vm204_vm0 = vcmp.ge.s32.totalorder (!%p637_p8), %v192_v21, 8 }
  0x51   :  { %v217_v25 = vsel (!%p637_p8), %vm215_vm13, 12, %v209_v24  ;;  %vm200_vm1 = vmand (!%p637_p8), %vm196_vm14, %vm198_vm15  ;;  %vm206_vm3 = vcmp.lt.s32.totalorder (!%p637_p8), %v192_v21, 12  ;;  %vm212_vm2 = vcmp.ge.s32.totalorder (!%p637_p8), %v192_v21, 12  ;;  %vm214_vm4 = vcmp.lt.s32.totalorder (!%p637_p8), %v192_v21, 16 }
  0x52   :  { %vm221_vm5 = vcmp.ge.s32.totalorder (!%p637_p8), %v194_v19, %v217_v25  ;;  %v202_v26 = vsel (!%p637_p8), %vm200_vm1, 4, %v814_v22  ;;  %vm208_vm6 = vmand (!%p637_p8), %vm204_vm0, %vm206_vm3  ;;  %vm220_vm10 = vcmp.le.s32.totalorder (!%p637_p8), %v194_v19, %v192_v21 }
  0x53   :  { %vm937_vm7 = vmand (!%p637_p8), %vm219_vm12, %vm221_vm5  ;;  %v210_v28 = vsel (!%p637_p8), %vm208_vm6, 8, %v202_v26  ;;  %vm1021_vm12 = vcmask (!%p637_p8), 261120  }
  0x54   :  { %vm216_vm9 = vmand (!%p637_p8), %vm212_vm2, %vm214_vm4  ;;  %vm274_vm2 = vcmask (!%p637_p8), 7168  }
  0x55   :  { %v218_v31 = vsel (!%p637_p8), %vm216_vm9, 12, %v210_v28  ;;  %vm1022_vm14 = vmmov (!%p637_p8), %vm1021_vm12 }
  0x56   :  { %vm222_vm11 = vcmp.ge.s32.totalorder (!%p637_p8), %v194_v19, %v218_v31 }
  0x57   :  { %vm945_vm13 = vmand (!%p637_p8), %vm220_vm10, %vm222_vm11 }
 0x11a   :  { %184 = sbr.rel (%p637_p8) target bundleno = 800 (0x320), region = 33 }
 0x11e   :  { %v666_v9 = vpop.f32.mrb[0].mxu0 }
 0x11f   :  { %v925_v10 = vmul.f32 0.17677669, %v666_v9  ;;  %v171_v11 = vpop.f32.mrb[1].mxu0  ;;  %v277_v9 = vld [vmem:[#allocation2] sm:$0xff] (!%p637_p8) }
 0x120   :  { %v927_v12 = vmul.f32 0.17677669, %v171_v11 }
 0x121   :  { %v226_v33 = vsel %vm945_vm13, %v925_v10, -1e+30 }
 0x122   :  { %v225_v29 = vsel %vm937_vm7, %v927_v12, -1e+30  ;;  %v233_v34 = vsel %vm229_vm8, %v226_v33, -inf }
 0x123   :  { %v230_v30 = vsel %vm229_vm8, %v225_v29, -inf }
 0x124   :  { %231 = vmax.xlane.f32.xlu0 %v230_v30 }
 0x128   :  { %234 = vmax.xlane.f32.xlu0 %v233_v34 }
 0x1b1   :  { %v232_v37 = vpop.xlane.xlu0 %231 }
 0x1b2   :  { %v236_v38 = vmax.f32 %v227_v36, %v232_v37 }
 0x1b4   :  { %v238_v40 = vsub.f32 %v227_v36, %v236_v38  ;;  %376 = vst.msk [vmem:[#allocation3] sm:$0xff] %vm274_vm2, %v236_v38  ;;  %246 = vperm.xlu1 %707, %v236_v38  }
 0x1b5   :  { %v235_v41 = vpop.xlane.xlu0 %234 }
 0x1b6   :  { %v237_v42 = vmax.f32 %v228_v39, %v235_v41  ;;  %v240_v58 = vmul.f32 1.442695, %v238_v40 }
 0x1b8   :  { %v239_v43 = vsub.f32 %v228_v39, %v237_v42  ;;  %377 = vst.msk [vmem:[#allocation3 + $0x8] sm:$0xff] %vm274_vm2, %v237_v42  ;;  %251 = vperm.xlu1 %707, %v237_v42  }
 0x1ba   :  { %v242_v57 = vmul.f32 1.442695, %v239_v43 }
 0x233   :  { %v247_v45 = vpop.permute.xlu1 %246 }
 0x234   :  { %v254_v46 = vsub.f32 %v225_v29, %v247_v45 }
 0x236   :  { %v256_v47 = vmul.f32 1.442695, %v254_v46 }
 0x237   :  { %v252_v48 = vpop.permute.xlu1 %251 }
 0x238   :  { %709 = vpow2.f32 %v256_v47  ;;  %v255_v49 = vsub.f32 %v226_v33, %v252_v48 }
 0x23a   :  { %v258_v50 = vmul.f32 1.442695, %v255_v49 }
 0x23c   :  { %711 = vpow2.f32 %v258_v50 }
 0x23d   :  { %713 = vpow2.f32 %v242_v57 }
 0x23e   :  { %715 = vpow2.f32 %v240_v58 }
 0x242   :  { %v710_v51 = vpop.eup %709 }
 0x243   :  { %v260_v52 = vsel %vm937_vm7, %v710_v51, 0.0 }
 0x244   :  { %671 = vmatprep.mubr.msk.f32.mxu0 %vm229_vm8, %v260_v52  ;;  %v266_v53 = vsel %vm229_vm8, %v260_v52, 0.0 }
 0x245   :  { %267 = vadd.xlane.f32.xlu0 %v266_v53 }
 0x246   :  { %v712_v54 = vpop.eup %711 }
 0x247   :  { %v261_v55 = vsel %vm945_vm13, %v712_v54, 0.0  ;;  %v714_v59 = vpop.eup %713 }
 0x248   :  { %672 = vmatmul.mubr.msk.f32.vlgmr.msra.gmra.mrb[0].mxu0 %vm229_vm8, %v261_v55  ;;  %v269_v56 = vsel %vm229_vm8, %v261_v55, 0.0  ;;  %v716_v60 = vpop.eup %715  ;;  %v265_v2 = vmul.f32 %v714_v59, %v263_v0 }
 0x249   :  { %270 = vadd.xlane.f32.xlu1 %v269_v56  ;;  %v264_v62 = vmul.f32 %v716_v60, %v262_v61 }
 0x25a   :  { %286 = vperm.xlu1 %707, %v714_v59  }
 0x25b   :  { %281 = vperm.xlu0 %708, %v716_v60  }
 0x2d2   :  { %v268_v63 = vpop.xlane.xlu0 %267 }
 0x2d3   :  { %v272_v1 = vadd.f32 %v268_v63, %v264_v62 }
 0x2d5   :  { %275 = vst.msk [vmem:[#allocation4] sm:$0xff] %vm274_vm2, %v272_v1 }
 0x2d6   :  { %v271_v3 = vpop.xlane.xlu1 %270 }
 0x2d7   :  { %v273_v4 = vadd.f32 %v271_v3, %v265_v2 }
 0x2d9   :  { %276 = vst.msk [vmem:[#allocation4 + $0x8] sm:$0xff] %vm274_vm2, %v273_v4 }
 0x2da   :  { %v287_v8 = vpop.permute.xlu1 %286  ;;  %v282_v11 = vpop.permute.xlu0 %281 }
 0x2db   :  { %v290_v13 = vmul.f32 %v287_v8, %v278_v7  ;;  %v289_v14 = vmul.f32 %v282_v11, %v277_v9 }
 0x31b   :  { %v673_v15 = vpop.f32.mrb[0].mxu0 }
 0x31c   :  { %v373_v16 = vadd.f32 %v673_v15, %v290_v13  ;;  %v363_v17 = vpop.f32.mrb[1].mxu0 }
 0x31d   :  { %v372_v18 = vadd.f32 %v363_v17, %v289_v14 }
 0x31e   :  { %375 = vst.msk [vmem:[#allocation2 + $0x8] sm:$0xff] %vm1021_vm12, %v373_v16 }
 0x31f   :  { %374 = vst.msk [vmem:[#allocation2] sm:$0xff] %vm1022_vm14, %v372_v18 }
 0x320 PF:  { %p640_p9 = scmp.ne.s32.totalorder %s66_s11, 0 }
 0x321   :  { %vm384_vm15 = vcmask (!%p640_p9), 130048   ;;  %v816_v21 = vmov (!%p640_p9), 0   ;;  %v382_v22 = vld [vmem:[#allocation3] sm:$0xff] (!%p640_p9)  ;;  %vm427_vm0 = vcmask (!%p640_p9), 7168   ;;  %v383_v25 = vld [vmem:[#allocation3 + $0x8] sm:$0xff] (!%p640_p9)  ;;  %v691_v30 = vpack.c.bf16 (!%p640_p9), %v920_v6, %v917_v5  ;;  %v415_v41 = vld [vmem:[#allocation4] sm:$0xff] (!%p640_p9) }
 0x322   :  { %381 = sbr.rel (%p640_p9) target bundleno = 1310 (0x51e), region = 37  ;;  %v385_v19 = vsel (!%p640_p9), %vm384_vm15, %v927_v12, -inf  ;;  %v388_v20 = vsel (!%p640_p9), %vm384_vm15, %v925_v10, -inf  ;;  %717 = vset.pattern.permute.xlu1 (!%p640_p9), %v816_v21  ;;  %718 = vset.pattern.permute.xlu0 (!%p640_p9), %v816_v21  ;;  %v416_v44 = vld [vmem:[#allocation4 + $0x8] sm:$0xff] (!%p640_p9)  ;;  %vm1023_vm1 = vcmask (!%p640_p9), 261120  }
 0x323   :  { %386 = vmax.xlane.f32.xlu0 (!%p640_p9), %v385_v19  ;;  %692 = vmatprep.subr.bf16.mxu0 (!%p640_p9), %v691_v30  ;;  %vm1024_vm3 = vmmov (!%p640_p9), %vm1023_vm1 }
 0x324   :  { %694 = vmatpush3.bf16.msra.mxu0 (!%p640_p9), %v691_v30 }
 0x325   :  { %v431_v49 = vld [vmem:[#allocation2 + $0x8] sm:$0xff] (!%p640_p9) }
 0x326   :  { %v430_v51 = vld [vmem:[#allocation2] sm:$0xff] (!%p640_p9) }
 0x327   :  { %389 = vmax.xlane.f32.xlu0 (!%p640_p9), %v388_v20 }
 0x3b0   :  { %v387_v23 = vpop.xlane.xlu0 %386 }
 0x3b1   :  { %v391_v24 = vmax.f32 %v382_v22, %v387_v23 }
 0x3b3   :  { %v393_v26 = vsub.f32 %v382_v22, %v391_v24  ;;  %529 = vst.msk [vmem:[#allocation3] sm:$0xff] %vm427_vm0, %v391_v24  ;;  %401 = vperm.xlu1 %717, %v391_v24  }
 0x3b4   :  { %v390_v27 = vpop.xlane.xlu0 %389 }
 0x3b5   :  { %v392_v28 = vmax.f32 %v383_v25, %v390_v27 }
 0x3b7   :  { %v394_v29 = vsub.f32 %v383_v25, %v392_v28  ;;  %530 = vst.msk [vmem:[#allocation3 + $0x8] sm:$0xff] %vm427_vm0, %v392_v28  ;;  %406 = vperm.xlu1 %717, %v392_v28  }
 0x3b9   :  { %v397_v6 = vmul.f32 1.442695, %v394_v29 }
 0x432   :  { %v402_v31 = vpop.permute.xlu1 %401 }
 0x433   :  { %v409_v32 = vsub.f32 %v927_v12, %v402_v31  ;;  %v395_v12 = vmul.f32 1.442695, %v393_v26 }
 0x435   :  { %v411_v33 = vmul.f32 1.442695, %v409_v32 }
 0x436   :  { %v407_v34 = vpop.permute.xlu1 %406 }
 0x437   :  { %719 = vpow2.f32 %v411_v33  ;;  %v410_v35 = vsub.f32 %v925_v10, %v407_v34 }
 0x439   :  { %v413_v36 = vmul.f32 1.442695, %v410_v35 }
 0x43b   :  { %721 = vpow2.f32 %v413_v36 }
 0x43c   :  { %723 = vpow2.f32 %v397_v6 }
 0x43d   :  { %725 = vpow2.f32 %v395_v12 }
 0x441   :  { %v720_v37 = vpop.eup %719 }
 0x442   :  { %678 = vmatprep.mubr.msk.f32.mxu0 %vm384_vm15, %v720_v37  ;;  %v419_v38 = vsel %vm384_vm15, %v720_v37, 0.0 }
 0x443   :  { %420 = vadd.xlane.f32.xlu0 %v419_v38 }
 0x445   :  { %v722_v39 = vpop.eup %721 }
 0x446   :  { %679 = vmatmul.mubr.msk.f32.vlgmr.msra.gmra.mrb[0].mxu0 %vm384_vm15, %v722_v39  ;;  %v422_v5 = vsel %vm384_vm15, %v722_v39, 0.0  ;;  %v724_v40 = vpop.eup %723 }
 0x447   :  { %423 = vadd.xlane.f32.xlu1 %v422_v5  ;;  %v726_v10 = vpop.eup %725  ;;  %v418_v46 = vmul.f32 %v724_v40, %v416_v44 }
 0x448   :  { %v417_v42 = vmul.f32 %v726_v10, %v415_v41 }
 0x458   :  { %439 = vperm.xlu1 %717, %v724_v40  }
 0x459   :  { %434 = vperm.xlu0 %718, %v726_v10  }
 0x4d0   :  { %v421_v43 = vpop.xlane.xlu0 %420 }
 0x4d1   :  { %v425_v45 = vadd.f32 %v421_v43, %v417_v42 }
 0x4d3   :  { %428 = vst.msk [vmem:[#allocation4] sm:$0xff] %vm427_vm0, %v425_v45 }
 0x4d4   :  { %v424_v47 = vpop.xlane.xlu1 %423 }
 0x4d5   :  { %v426_v48 = vadd.f32 %v424_v47, %v418_v46 }
 0x4d7   :  { %429 = vst.msk [vmem:[#allocation4 + $0x8] sm:$0xff] %vm427_vm0, %v426_v48 }
 0x4d8   :  { %v440_v50 = vpop.permute.xlu1 %439  ;;  %v435_v52 = vpop.permute.xlu0 %434 }
 0x4d9   :  { %v443_v53 = vmul.f32 %v440_v50, %v431_v49  ;;  %v442_v54 = vmul.f32 %v435_v52, %v430_v51 }
 0x519   :  { %v680_v55 = vpop.f32.mrb[0].mxu0 }
 0x51a   :  { %v526_v56 = vadd.f32 %v680_v55, %v443_v53  ;;  %v516_v57 = vpop.f32.mrb[1].mxu0 }
 0x51b   :  { %v525_v58 = vadd.f32 %v516_v57, %v442_v54 }
 0x51c   :  { %528 = vst.msk [vmem:[#allocation2 + $0x8] sm:$0xff] %vm1023_vm1, %v526_v56 }
 0x51d   :  { %527 = vst.msk [vmem:[#allocation2] sm:$0xff] %vm1024_vm3, %v525_v58 }
 0x51e PF:  { %p643_p10 = scmp.eq.s32.totalorder %s62_s7, 0 }
 0x51f   :  { %v534_v59 = vld [vmem:[#allocation4] sm:$0xff] (!%p643_p10)  ;;  %v535_v60 = vld [vmem:[#allocation4 + $0x8] sm:$0xff] (!%p643_p10)  ;;  %v817_v61 = vmov (!%p643_p10), 0   ;;  %v556_v2 = vlaneseq (!%p643_p10)  ;;  %v559_v4 = vstv (!%p643_p10), %s629_s16  ;;  %v818_v11 = vmov (!%p643_p10), 17  }
 0x520   :  { %533 = sbr.rel (%p643_p10) target bundleno = 1461 (0x5b5), region = 41  ;;  %727 = vset.pattern.permute.xlu0 (!%p643_p10), %v817_v61  ;;  %vm536_vm4 = vcmp.eq.f32.partialorder (!%p643_p10), %v534_v59, 0.0  ;;  %vm537_vm5 = vcmp.eq.f32.partialorder (!%p643_p10), %v535_v60, 0.0 }
 0x521   :  { %v538_v62 = vsel (!%p643_p10), %vm536_vm4, 1.0, %v534_v59  ;;  %v539_v63 = vsel (!%p643_p10), %vm537_vm5, 1.0, %v535_v60  ;;  %v557_v3 = vshrl.u32 (!%p643_p10), %v556_v2, 7 }
 0x522   :  { %728 = vrcp.f32 (!%p643_p10), %v538_v62 }
 0x523   :  { %730 = vrcp.f32 (!%p643_p10), %v539_v63  ;;  %v560_v7 = vadd.s32 (!%p643_p10), %v559_v4, %v557_v3  ;;  %v558_v8 = vadd.s32 (!%p643_p10), 8, %v557_v3  ;;  %v541_v22 = vld [vmem:[#allocation2 + $0x8] sm:$0xff] (!%p643_p10) }
 0x524   :  { %v540_v17 = vld [vmem:[#allocation2] sm:$0xff] (!%p643_p10) }
 0x525   :  { %vm562_vm8 = vcmp.ge.s32.totalorder (!%p643_p10), %v560_v7, 4  ;;  %vm564_vm6 = vcmp.lt.s32.totalorder (!%p643_p10), %v560_v7, 8  ;;  %v561_v9 = vadd.s32 (!%p643_p10), %v559_v4, %v558_v8  ;;  %vm570_vm9 = vcmp.ge.s32.totalorder (!%p643_p10), %v560_v7, 8 }
 0x526   :  { %vm566_vm7 = vmand (!%p643_p10), %vm562_vm8, %vm564_vm6  ;;  %vm572_vm10 = vcmp.lt.s32.totalorder (!%p643_p10), %v560_v7, 12  ;;  %vm578_vm12 = vcmp.ge.s32.totalorder (!%p643_p10), %v560_v7, 12  ;;  %vm580_vm14 = vcmp.lt.s32.totalorder (!%p643_p10), %v560_v7, 16 }
 0x527   :  { %vm563_vm11 = vcmp.ge.s32.totalorder %v561_v9, 4  ;;  %vm565_vm13 = vcmp.lt.s32.totalorder %v561_v9, 8  ;;  %v568_v13 = vsel %vm566_vm7, 4, %v818_v11  ;;  %vm574_vm2 = vmand %vm570_vm9, %vm572_vm10  ;;  %vm571_vm0 = vcmp.ge.s32.totalorder %v561_v9, 8 }
 0x528   :  { %vm567_vm15 = vmand %vm563_vm11, %vm565_vm13  ;;  %vm573_vm1 = vcmp.lt.s32.totalorder %v561_v9, 12  ;;  %v576_v14 = vsel %vm574_vm2, 8, %v568_v13  ;;  %vm579_vm5 = vcmp.ge.s32.totalorder %v561_v9, 12  ;;  %vm581_vm6 = vcmp.lt.s32.totalorder %v561_v9, 16 }
 0x529   :  { %vm582_vm3 = vmand %vm578_vm12, %vm580_vm14  ;;  %v569_v15 = vsel %vm567_vm15, 4, %v818_v11  ;;  %vm594_vm9 = vcmask 261120  }
 0x52a   :  { %vm575_vm4 = vmand %vm571_vm0, %vm573_vm1  ;;  %v584_v16 = vsel %vm582_vm3, 12, %v576_v14 }
 0x52b   :  { %v577_v18 = vsel %vm575_vm4, 8, %v569_v15  ;;  %vm583_vm8 = vmand %vm579_vm5, %vm581_vm6  ;;  %vm586_vm7 = vcmp.le.s32.totalorder %v584_v16, %v560_v7 }
 0x52c   :  { %v729_v0 = vpop.eup %728  ;;  %v585_v21 = vsel %vm583_vm8, 12, %v577_v18 }
 0x52d   :  { %546 = vperm.xlu0 %727, %v729_v0   ;;  %v731_v1 = vpop.eup %730  ;;  %vm587_vm10 = vcmp.le.s32.totalorder %v585_v21, %v561_v9 }
 0x531   :  { %551 = vperm.xlu0 %727, %v731_v1  }
 0x5ac   :  { %v547_v19 = vpop.permute.xlu0 %546 }
 0x5ad   :  { %v554_v20 = vmul.f32 %v547_v19, %v540_v17 }
 0x5af   :  { %v592_v23 = vsel %vm586_vm7, %v554_v20, 0.0 }
 0x5b0   :  { %595 = vst.msk [vmem:[#allocation14] sm:$0xff] %vm594_vm9, %v592_v23  ;;  %v552_v24 = vpop.permute.xlu0 %551 }
 0x5b1   :  { %v555_v25 = vmul.f32 %v552_v24, %v541_v22 }
 0x5b3   :  { %v593_v26 = vsel %vm587_vm10, %v555_v25, 0.0 }
 0x5b4   :  { %596 = vst.msk [vmem:[#allocation14 + $0x8] sm:$0xff] %vm594_vm9, %v593_v26 }
 0x5b5 PF:  { %s599_s2 = sld [smem:[#allocation6]]  ;;  %s819_s25 = smov [#allocation14]  }
 0x5b6   :  { %s606_s26 = sshll.u32 %s819_s25, 4  ;;  %s607_s26 = int_to_ptr.vmem [resolvable:$true] %s606_s26 }
 0x5b7   :  { %s778_s8 = scalar_lea.vmem %s607_s26, 256  ;;  %p783_p12 = scmp.lt.s32.totalorder %s607_s26, %s607_s26 }
 0x5b8   :  { %p779_p11 = scmp.ne.s32.totalorder %s607_s26, %s778_s8  ;;  %p784_p13 = scmp.lt.s32.totalorder %s778_s8, %s778_s8 }
 0x5ba   :  { %p785_p0 = por %p784_p13, %p783_p12 }
 0x5bb   :  { %s647_s28 = sshll.u32 %s599_s2, 8 }
 0x5bc   :  { %s605_s7 = scalar_lea.hbm %s1015_s6, %s647_s28  ;;  %p786_p1 = pnand %p785_p0, %p779_p11 }
 0x5be   :  { %789 = shalt.err (!%p786_p1)
}
 0x5bf   :  { %s790_s9 = scalar_lea.hbm %s605_s7, 256  ;;  %s792_s4 = scalar_lea.hbm %s1015_s6, 256 }
 0x5c0   :  { %p791_p2 = scmp.ne.s32.totalorder %s605_s7, %s790_s9  ;;  %p793_p3 = scmp.lt.u32.totalorder %s605_s7, %s1015_s6 }
 0x5c1   :  { %p794_p4 = scmp.lt.u32.totalorder %s792_s4, %s790_s9  ;;  %p796_p6 = scmp.lt.u32.totalorder %s790_s9, %s605_s7 }
 0x5c3   :  { %p795_p5 = por %p794_p4, %p793_p3 }
 0x5c5   :  { %p797_p7 = por %p796_p6, %p795_p5 }
 0x5c7   :  { %p798_p8 = pnand %p797_p7, %p791_p2 }
 0x5c9   :  { %801 = shalt.err (!%p798_p8)
}
 0x5ca   :  { %612 = dma.vmem_to_hbm [thread:$0]  %s607_s26, 256, %s605_s7, [#allocation11], %s810_s14, %s810_s14, %s811_s15  }
 0x5cb   :  { %806 = dma.done.wait [#allocation11], 256  }
 0x5cc   :  { %807 = vsyncadd [#allocation11], 4294967040 }
 0x5cd   :  { %616 = vsyncpa [#allocation10], 1 }
 0x5ce   :  { %617 = vsyncpa [#allocation13], 1 }
 0x5cf   :  { %618 = vsyncpa [#allocation11], 1 }

</bundles_post_ra>
